<compile_context>
chip_gen: v7x
topology: tpu7x:2x2x1
jax: 0.10.0
libtpu: 0.0.40
codegen_flags: <defaults>
</compile_context>

<pallas_src>
import math

import jax
import jax.numpy as jnp
from jax.experimental import pallas as pl
from jax.experimental.pallas import tpu as pltpu

# ------------------------- SDE hyper-parameters (OU-VE forward SDE) -----------
STIFFNESS = 1.5
STD_MIN = 0.05
STD_MAX = 0.5
TIME_MIN = 3e-2
TIME_MAX = 1.0
NUM_STEPS = 1000
SDE_DT = TIME_MAX / NUM_STEPS  # StochasticDifferentialEquation.dt


def _round_up(x, m):
    return ((x + m - 1) // m) * m


def _vmem_capacity_bytes():
    try:
        return int(pltpu.get_tpu_info().vmem_capacity_bytes)
    except Exception:
        return 64 * 1024 * 1024  # conservative (v7x per-TC VMEM)


def _plan_tiles(DT, C, n_big_streams, dtype_bytes, batch):
    """Chip-aware lane-tile planning + explicit VMEM limit.

    Per-step VMEM ~= 2 (double-buffer) * n_big_streams * C * TL * dtype_bytes,
    capped at ~45% of the chip's VMEM so it fits v7x (64 MiB) and v5e/v6e defaults
    are overridden with vmem_limit_bytes.
    """
    capacity = _vmem_capacity_bytes()
    budget = int(0.45 * capacity)
    per_lane = max(1, 2 * n_big_streams * C * dtype_bytes)
    tl_cap = max(128, (budget // per_lane) // 128 * 128)
    tl_cap = min(tl_cap, 32768)  # diminishing returns past a few K lanes
    tl = min(tl_cap, _round_up(DT, 128))
    dtp = _round_up(DT, tl)
    n_tiles = dtp // tl
    # v7x has 2 TensorCores: guarantee >= 2 parallel grid steps.
    if batch * n_tiles < 2 and dtp % 256 == 0:
        tl = dtp // 2
        n_tiles = 2
    per_step = (2 * n_big_streams * C * tl * dtype_bytes  # big streams, 2-deep
                + 2 * tl * 4                              # t-index row
                + 256 * 1024)                             # small blocks + slack
    vmem_limit = int(min(0.9 * capacity, max(32 * 1024 * 1024, 3 * per_step)))
    return tl, dtp, n_tiles, vmem_limit


# ------------------------------ Pallas kernel ---------------------------------
def _make_kernel(*, apply_mask, has_cond, return_mean):
    k_dt = STIFFNESS * SDE_DT

    def kernel(*refs):
        it = iter(refs)
        state_ref = next(it)                         # (C,  TL)  stream dtype
        prior_ref = next(it)                         # (C,  TL)
        cond_ref = next(it) if has_cond else None    # (C2, TL)
        z_ref = next(it)                             # (C,  TL)
        ws_ref = next(it)                            # (C, C)   g^2*FiLM-folded conv (state part)
        wc_ref = next(it) if has_cond else None      # (C, C2)  (cond part)
        c_ref = next(it)                             # (C, 1)   f32 folded bias
        g_ref = next(it)                             # (C, 1)   f32 forward diffusion
        if apply_mask:
            len_ref = next(it)                       # (C, 1)   int32 valid lengths
            tidx_ref = next(it)                      # (1, TL)  int32 time index per lane
        new_ref = next(it)                           # (C, TL)
        mean_ref = next(it) if return_mean else None

        x = state_ref[...]
        # score term = g^2 * FiLM(conv1x1([state, cond]))  (all factors pre-folded,
        # MXU matmul in storage dtype with f32 accumulation)
        s = jnp.dot(ws_ref[...], x, preferred_element_type=jnp.float32)
        if has_cond:
            s = s + jnp.dot(wc_ref[...], cond_ref[...],
                            preferred_element_type=jnp.float32)
        score_term = s + c_ref[...]

        # reverse SDE discretization (f32 compute)
        state = x.astype(jnp.float32)
        drift = k_dt * (prior_ref[...].astype(jnp.float32) - state) - score_term
        z = z_ref[...].astype(jnp.float32)

        if apply_mask:
            # sequence-length mask rebuilt from tiny int32 inputs (compare only,
            # no modulo, no HBM-resident full mask)
            m = (tidx_ref[...] < len_ref[...]).astype(jnp.float32)
            state = state * m
            drift = drift * m
            z = z * m

        mean = state - drift
        new_ref[...] = (mean + g_ref[...] * z).astype(new_ref.dtype)
        if return_mean:
            mean_ref[...] = mean.astype(mean_ref.dtype)

    return kernel


# ------------------------------ glue (plain JAX) -------------------------------
def _film_params(time, params):
    """Tiny time-embedding MLP producing per-(batch, channel) FiLM scale/shift."""
    ang = 2.0 * math.pi * time[:, None] * params["freqs"][None, :]
    emb = jnp.concatenate([jnp.sin(ang), jnp.cos(ang)], axis=-1)        # (B, 2F)
    h = jax.nn.silu(emb @ params["w1"] + params["b1"])                  # (B, H)
    out = h @ params["w2"] + params["b2"]                               # (B, 2C)
    scale, shift = jnp.split(out, 2, axis=-1)
    return scale, shift                                                 # (B, C) each


def reverse_diffusion_predictor(state, time, prior_mean, z_norm, params,
                                score_condition=None, state_length=None,
                                stream_dtype=jnp.bfloat16, return_mean=True):
    """Returns (new_state, mean) shaped (B, C, D, T) (or just new_state)."""
    B, C, D, T = state.shape
    DT = D * T
    has_cond = score_condition is not None
    apply_mask = state_length is not None
    dtype_bytes = jnp.dtype(stream_dtype).itemsize

    n_big = 3 + (1 if has_cond else 0) + 1 + (1 if return_mean else 0)
    TL, DTp, n_tiles, vmem_limit = _plan_tiles(DT, C, n_big, dtype_bytes, B)

    # --- per-batch forward diffusion g and FiLM params from the time embedding ---
    log_ratio = math.log(STD_MAX / STD_MIN)
    std = STD_MIN * (STD_MAX / STD_MIN) ** time
    g = (std * math.sqrt(2.0 * log_ratio) * math.sqrt(SDE_DT)).astype(jnp.float32)
    scale, shift = _film_params(time, params)                           # (B, C)

    # --- fold g^2 and FiLM into per-batch (C, C_in) conv weights / (C,) bias ---
    g2 = (g * g)[:, None]                                               # (B, 1)
    a = g2 * (1.0 + scale)                                              # (B, C)
    w_conv = params["w_conv"].astype(jnp.float32)                       # (C, C_in)
    b_conv = params["b_conv"].reshape(C).astype(jnp.float32)            # (C,)
    c_eff = (g2 * ((1.0 + scale) * b_conv[None, :] + shift)
             ).reshape(B, C, 1).astype(jnp.float32)
    ws = (a[:, :, None] * w_conv[None, :, :C]).astype(stream_dtype)     # (B, C, C)
    g_row = jnp.broadcast_to(g[:, None, None], (B, C, 1)).astype(jnp.float32)

    def pad_lanes(x3):
        if DTp != DT:
            x3 = jnp.pad(x3, ((0, 0), (0, 0), (0, DTp - DT)))
        return x3

    def to_stream(x):
        return pad_lanes(x.reshape(x.shape[0], x.shape[1], DT)).astype(stream_dtype)

    big_spec = pl.BlockSpec((pl.Squeezed(), C, TL), lambda b, j: (b, 0, j))

    def per_batch_spec(r, c):
        return pl.BlockSpec((pl.Squeezed(), r, c), lambda b, j: (b, 0, 0))

    in_specs = [big_spec, big_spec]
    args = [to_stream(state), to_stream(prior_mean)]
    if has_cond:
        C2 = score_condition.shape[1]
        in_specs.append(pl.BlockSpec((pl.Squeezed(), C2, TL), lambda b, j: (b, 0, j)))
        args.append(to_stream(score_condition))
    in_specs.append(big_spec)
    args.append(to_stream(z_norm))

    in_specs.append(per_batch_spec(C, C))
    args.append(ws)
    if has_cond:
        wc = (a[:, :, None] * w_conv[None, :, C:C + C2]).astype(stream_dtype)
        in_specs.append(per_batch_spec(C, C2))
        args.append(wc)
    in_specs.append(per_batch_spec(C, 1))
    args.append(c_eff)
    in_specs.append(per_batch_spec(C, 1))
    args.append(g_row)
    if apply_mask:
        len3 = jnp.broadcast_to(
            state_length.astype(jnp.int32)[:, None, None], (B, C, 1))
        in_specs.append(per_batch_spec(C, 1))
        args.append(len3)
        tidx = (jnp.arange(DTp, dtype=jnp.int32) % T).reshape(1, DTp)
        in_specs.append(pl.BlockSpec((1, TL), lambda b, j: (0, j)))
        args.append(tidx)

    if return_mean:
        out_specs = (big_spec, big_spec)
        out_shape = (jax.ShapeDtypeStruct((B, C, DTp), stream_dtype),
                     jax.ShapeDtypeStruct((B, C, DTp), stream_dtype))
    else:
        out_specs = big_spec
        out_shape = jax.ShapeDtypeStruct((B, C, DTp), stream_dtype)

    kernel = _make_kernel(apply_mask=apply_mask, has_cond=has_cond,
                          return_mean=return_mean)

    res = pl.pallas_call(
        kernel,
        grid=(B, n_tiles),
        in_specs=in_specs,
        out_specs=out_specs,
        out_shape=out_shape,
        compiler_params=pltpu.CompilerParams(
            dimension_semantics=("parallel", "parallel"),
            vmem_limit_bytes=vmem_limit),
    )(*args)

    def unstream(x3):
        return x3[..., :DT].reshape(B, C, D, T)

    if return_mean:
        new3, mean3 = res
        return unstream(new3), unstream(mean3)
    return unstream(res)


# ------------------------------ reference (pure JAX, f32) ----------------------
def _reference(state, time, prior_mean, z_norm, params,
               score_condition=None, state_length=None):
    B, C, D, T = state.shape
    score_in = state if score_condition is None else jnp.concatenate(
        [state, score_condition], axis=1)
    scale, shift = _film_params(time, params)
    score = jnp.einsum("oc,bcdt->bodt", params["w_conv"], score_in)
    score = score + params["b_conv"].reshape(1, C, 1, 1)
    score = score * (1.0 + scale[:, :, None, None]) + shift[:, :, None, None]

    log_ratio = math.log(STD_MAX / STD_MIN)
    std = STD_MIN * (STD_MAX / STD_MIN) ** time
    g = (std * math.sqrt(2.0 * log_ratio) * math.sqrt(SDE_DT))[:, None, None, None]
    fwd_drift = STIFFNESS * (prior_mean - state) * SDE_DT
    drift = fwd_drift - g * g * score
    diffusion = jnp.broadcast_to(g, state.shape)

    if state_length is not None:
        m = (jnp.arange(T)[None, None, None, :]
             < state_length[:, None, None, None]).astype(state.dtype)
        drift = drift * m
        diffusion = diffusion * m
    mean = state - drift
    new_state = mean + diffusion * z_norm
    if state_length is not None:
        new_state = new_state * m
        mean = mean * m
    return new_state, mean


# ------------------------------------ main --------------------------------------
if __name__ == "__main__":
    B, C, D, T = 2, 4, 16, 16
    F, H = 16, 32
    C_in = 2 * C  # state concatenated with score_condition along channels

    key = jax.random.PRNGKey(0)
    ks = jax.random.split(key, 10)

    params = {
        "freqs": jax.random.normal(ks[0], (F,), jnp.float32) * 4.0,
        "w1": jax.random.normal(ks[1], (2 * F, H), jnp.float32) * 0.1,
        "b1": jnp.zeros((H,), jnp.float32),
        "w2": jax.random.normal(ks[2], (H, 2 * C), jnp.float32) * 0.1,
        "b2": jnp.zeros((2 * C,), jnp.float32),
        "w_conv": jax.random.normal(ks[3], (C, C_in), jnp.float32) * 0.2,
        "b_conv": jnp.zeros((C, 1), jnp.float32),
    }

    state = jax.random.normal(ks[4], (B, C, D, T), jnp.float32)
    prior_mean = jax.random.normal(ks[5], (B, C, D, T), jnp.float32)
    score_condition = jax.random.normal(ks[6], (B, C, D, T), jnp.float32)
    time = TIME_MIN + (TIME_MAX - TIME_MIN) * jax.random.uniform(ks[7], (B,), jnp.float32)
    state_length = jnp.array([T, 10], jnp.int32)   # exercises the length mask
    # torch.randn_like(state) -> drawn here and passed into the kernel
    z_norm = jax.random.normal(ks[8], (B, C, D, T), jnp.float32)

    ref_new, ref_mean = _reference(
        state, time, prior_mean, z_norm, params,
        score_condition=score_condition, state_length=state_length)

    # f32 stream path (numerically matches the PyTorch module)
    new_f32, mean_f32 = reverse_diffusion_predictor(
        state, time, prior_mean, z_norm, params,
        score_condition=score_condition, state_length=state_length,
        stream_dtype=jnp.float32, return_mean=True)
    jax.block_until_ready((new_f32, mean_f32))
    assert new_f32.shape == (B, C, D, T) and mean_f32.shape == (B, C, D, T)
    assert jnp.allclose(new_f32, ref_new, atol=1e-4, rtol=1e-4)
    assert jnp.allclose(mean_f32, ref_mean, atol=1e-4, rtol=1e-4)

    # bf16 stream path (default; half the HBM traffic of the mem-bound kernel)
    new_bf16, mean_bf16 = reverse_diffusion_predictor(
        state, time, prior_mean, z_norm, params,
        score_condition=score_condition, state_length=state_length,
        stream_dtype=jnp.bfloat16, return_mean=True)
    jax.block_until_ready((new_bf16, mean_bf16))
    assert jnp.allclose(new_bf16.astype(jnp.float32), ref_new, atol=5e-2, rtol=5e-2)
    assert jnp.allclose(mean_bf16.astype(jnp.float32), ref_mean, atol=5e-2, rtol=5e-2)

    print("KERNEL_OK")
</pallas_src>

<mosaic_0001>
module attributes {stable_mosaic.version = 11 : i64} {
  func.func @kernel(%arg0: i32, %arg1: i32, %arg2: memref<1x4x256xf32, #tpu.memory_space<vmem>>, %arg3: memref<1x4x256xf32, #tpu.memory_space<vmem>>, %arg4: memref<1x4x256xf32, #tpu.memory_space<vmem>>, %arg5: memref<1x4x256xf32, #tpu.memory_space<vmem>>, %arg6: memref<1x4x4xf32, #tpu.memory_space<vmem>>, %arg7: memref<1x4x4xf32, #tpu.memory_space<vmem>>, %arg8: memref<1x4x1xf32, #tpu.memory_space<vmem>>, %arg9: memref<1x4x1xf32, #tpu.memory_space<vmem>>, %arg10: memref<1x4x1xi32, #tpu.memory_space<vmem>>, %arg11: memref<1x256xi32, #tpu.memory_space<vmem>>, %arg12: memref<1x4x256xf32, #tpu.memory_space<vmem>>, %arg13: memref<1x4x256xf32, #tpu.memory_space<vmem>>) attributes {dimension_semantics = [#tpu.dimension_semantics<parallel>, #tpu.dimension_semantics<parallel>], iteration_bounds = array<i64: 2, 1>, scalar_prefetch = 0 : i64, scratch_operands = 0 : i64, tpu.core_type = #tpu.core_type<tc>, window_params = [{transform_indices = @transform_0, window_bounds = array<i64: 1, 4, 256>}, {transform_indices = @transform_1, window_bounds = array<i64: 1, 4, 256>}, {transform_indices = @transform_2, window_bounds = array<i64: 1, 4, 256>}, {transform_indices = @transform_3, window_bounds = array<i64: 1, 4, 256>}, {transform_indices = @transform_4, window_bounds = array<i64: 1, 4, 4>}, {transform_indices = @transform_5, window_bounds = array<i64: 1, 4, 4>}, {transform_indices = @transform_6, window_bounds = array<i64: 1, 4, 1>}, {transform_indices = @transform_7, window_bounds = array<i64: 1, 4, 1>}, {transform_indices = @transform_8, window_bounds = array<i64: 1, 4, 1>}, {transform_indices = @transform_9, window_bounds = array<i64: 1, 256>}, {transform_indices = @transform_10, window_bounds = array<i64: 1, 4, 256>}, {transform_indices = @transform_11, window_bounds = array<i64: 1, 4, 256>}]} {
    %c0 = arith.constant 0 : index
    %c0_0 = arith.constant 0 : index
    %c0_1 = arith.constant 0 : index
    %0 = vector.load %arg2[%c0, %c0_0, %c0_1] : memref<1x4x256xf32, #tpu.memory_space<vmem>>, vector<1x4x256xf32>
    %1 = vector.shape_cast %0 : vector<1x4x256xf32> to vector<4x256xf32>
    %c0_2 = arith.constant 0 : index
    %c0_3 = arith.constant 0 : index
    %c0_4 = arith.constant 0 : index
    %2 = vector.load %arg6[%c0_2, %c0_3, %c0_4] : memref<1x4x4xf32, #tpu.memory_space<vmem>>, vector<1x4x4xf32>
    %3 = vector.shape_cast %2 : vector<1x4x4xf32> to vector<4x4xf32>
    %cst = arith.constant dense<0.000000e+00> : vector<4x256xf32>
    %4 = tpu.matmul %3, %1, %cst {dimension_numbers = #tpu.dot_dimension_numbers<[1], [0], [0], [1], [0, 0, 1, 1], [], []>} : vector<4x4xf32>, vector<4x256xf32>, vector<4x256xf32> -> vector<4x256xf32>
    %c0_5 = arith.constant 0 : index
    %c0_6 = arith.constant 0 : index
    %c0_7 = arith.constant 0 : index
    %5 = vector.load %arg7[%c0_5, %c0_6, %c0_7] : memref<1x4x4xf32, #tpu.memory_space<vmem>>, vector<1x4x4xf32>
    %6 = vector.shape_cast %5 : vector<1x4x4xf32> to vector<4x4xf32>
    %c0_8 = arith.constant 0 : index
    %c0_9 = arith.constant 0 : index
    %c0_10 = arith.constant 0 : index
    %7 = vector.load %arg4[%c0_8, %c0_9, %c0_10] : memref<1x4x256xf32, #tpu.memory_space<vmem>>, vector<1x4x256xf32>
    %8 = vector.shape_cast %7 : vector<1x4x256xf32> to vector<4x256xf32>
    %cst_11 = arith.constant dense<0.000000e+00> : vector<4x256xf32>
    %9 = tpu.matmul %6, %8, %cst_11 {dimension_numbers = #tpu.dot_dimension_numbers<[1], [0], [0], [1], [0, 0, 1, 1], [], []>} : vector<4x4xf32>, vector<4x256xf32>, vector<4x256xf32> -> vector<4x256xf32>
    %10 = arith.addf %4, %9 : vector<4x256xf32>
    %c0_12 = arith.constant 0 : index
    %c0_13 = arith.constant 0 : index
    %c0_14 = arith.constant 0 : index
    %11 = vector.load %arg8[%c0_12, %c0_13, %c0_14] : memref<1x4x1xf32, #tpu.memory_space<vmem>>, vector<1x4x1xf32>
    %12 = vector.shape_cast %11 : vector<1x4x1xf32> to vector<4x1xf32>
    %13 = vector.broadcast %12 : vector<4x1xf32> to vector<4x256xf32>
    %14 = arith.addf %10, %13 : vector<4x256xf32>
    %c0_15 = arith.constant 0 : index
    %c0_16 = arith.constant 0 : index
    %c0_17 = arith.constant 0 : index
    %15 = vector.load %arg3[%c0_15, %c0_16, %c0_17] : memref<1x4x256xf32, #tpu.memory_space<vmem>>, vector<1x4x256xf32>
    %16 = vector.shape_cast %15 : vector<1x4x256xf32> to vector<4x256xf32>
    %17 = arith.subf %16, %1 : vector<4x256xf32>
    %cst_18 = arith.constant 1.500000e-03 : f32
    %18 = vector.broadcast %cst_18 : f32 to vector<4x256xf32>
    %19 = arith.mulf %18, %17 : vector<4x256xf32>
    %20 = arith.subf %19, %14 : vector<4x256xf32>
    %c0_19 = arith.constant 0 : index
    %c0_20 = arith.constant 0 : index
    %c0_21 = arith.constant 0 : index
    %21 = vector.load %arg5[%c0_19, %c0_20, %c0_21] : memref<1x4x256xf32, #tpu.memory_space<vmem>>, vector<1x4x256xf32>
    %22 = vector.shape_cast %21 : vector<1x4x256xf32> to vector<4x256xf32>
    %c0_22 = arith.constant 0 : index
    %c0_23 = arith.constant 0 : index
    %23 = vector.load %arg11[%c0_22, %c0_23] : memref<1x256xi32, #tpu.memory_space<vmem>>, vector<1x256xi32>
    %c0_24 = arith.constant 0 : index
    %c0_25 = arith.constant 0 : index
    %c0_26 = arith.constant 0 : index
    %24 = vector.load %arg10[%c0_24, %c0_25, %c0_26] : memref<1x4x1xi32, #tpu.memory_space<vmem>>, vector<1x4x1xi32>
    %25 = vector.shape_cast %24 : vector<1x4x1xi32> to vector<4x1xi32>
    %26 = vector.broadcast %23 : vector<1x256xi32> to vector<4x256xi32>
    %27 = vector.broadcast %25 : vector<4x1xi32> to vector<4x256xi32>
    %28 = arith.cmpi slt, %26, %27 : vector<4x256xi32>
    %29 = arith.extui %28 : vector<4x256xi1> to vector<4x256xi32>
    %30 = arith.sitofp %29 : vector<4x256xi32> to vector<4x256xf32>
    %31 = arith.mulf %1, %30 : vector<4x256xf32>
    %32 = arith.mulf %20, %30 : vector<4x256xf32>
    %33 = arith.mulf %22, %30 : vector<4x256xf32>
    %34 = arith.subf %31, %32 : vector<4x256xf32>
    %c0_27 = arith.constant 0 : index
    %c0_28 = arith.constant 0 : index
    %c0_29 = arith.constant 0 : index
    %35 = vector.load %arg9[%c0_27, %c0_28, %c0_29] : memref<1x4x1xf32, #tpu.memory_space<vmem>>, vector<1x4x1xf32>
    %36 = vector.shape_cast %35 : vector<1x4x1xf32> to vector<4x1xf32>
    %37 = vector.broadcast %36 : vector<4x1xf32> to vector<4x256xf32>
    %38 = arith.mulf %37, %33 : vector<4x256xf32>
    %39 = arith.addf %34, %38 : vector<4x256xf32>
    %c0_30 = arith.constant 0 : index
    %c0_31 = arith.constant 0 : index
    %c0_32 = arith.constant 0 : index
    %40 = vector.load %arg12[%c0_30, %c0_31, %c0_32] : memref<1x4x256xf32, #tpu.memory_space<vmem>>, vector<1x4x256xf32>
    %41 = vector.shape_cast %40 : vector<1x4x256xf32> to vector<4x256xf32>
    %42 = vector.shape_cast %39 : vector<4x256xf32> to vector<1x4x256xf32>
    tpu.vector_store %arg12[%c0_30, %c0_31, %c0_32], %42 {strides = array<i32>} : memref<1x4x256xf32, #tpu.memory_space<vmem>>, vector<1x4x256xf32>,
    %c0_33 = arith.constant 0 : index
    %c0_34 = arith.constant 0 : index
    %c0_35 = arith.constant 0 : index
    %43 = vector.load %arg13[%c0_33, %c0_34, %c0_35] : memref<1x4x256xf32, #tpu.memory_space<vmem>>, vector<1x4x256xf32>
    %44 = vector.shape_cast %43 : vector<1x4x256xf32> to vector<4x256xf32>
    %45 = vector.shape_cast %34 : vector<4x256xf32> to vector<1x4x256xf32>
    tpu.vector_store %arg13[%c0_33, %c0_34, %c0_35], %45 {strides = array<i32>} : memref<1x4x256xf32, #tpu.memory_space<vmem>>, vector<1x4x256xf32>,
    return
  }
  func.func @transform_0(%arg0: i32, %arg1: i32) -> (i32, i32, i32) {
    %c0_i32 = arith.constant 0 : i32
    %c0_i32_0 = arith.constant 0 : i32
    return %arg0, %c0_i32, %arg1 : i32, i32, i32
  }
  func.func @transform_1(%arg0: i32, %arg1: i32) -> (i32, i32, i32) {
    %c0_i32 = arith.constant 0 : i32
    %c0_i32_0 = arith.constant 0 : i32
    return %arg0, %c0_i32, %arg1 : i32, i32, i32
  }
  func.func @transform_2(%arg0: i32, %arg1: i32) -> (i32, i32, i32) {
    %c0_i32 = arith.constant 0 : i32
    %c0_i32_0 = arith.constant 0 : i32
    return %arg0, %c0_i32, %arg1 : i32, i32, i32
  }
  func.func @transform_3(%arg0: i32, %arg1: i32) -> (i32, i32, i32) {
    %c0_i32 = arith.constant 0 : i32
    %c0_i32_0 = arith.constant 0 : i32
    return %arg0, %c0_i32, %arg1 : i32, i32, i32
  }
  func.func @transform_4(%arg0: i32, %arg1: i32) -> (i32, i32, i32) {
    %c0_i32 = arith.constant 0 : i32
    %c0_i32_0 = arith.constant 0 : i32
    %c0_i32_1 = arith.constant 0 : i32
    return %arg0, %c0_i32, %c0_i32_0 : i32, i32, i32
  }
  func.func @transform_5(%arg0: i32, %arg1: i32) -> (i32, i32, i32) {
    %c0_i32 = arith.constant 0 : i32
    %c0_i32_0 = arith.constant 0 : i32
    %c0_i32_1 = arith.constant 0 : i32
    return %arg0, %c0_i32, %c0_i32_0 : i32, i32, i32
  }
  func.func @transform_6(%arg0: i32, %arg1: i32) -> (i32, i32, i32) {
    %c0_i32 = arith.constant 0 : i32
    %c0_i32_0 = arith.constant 0 : i32
    %c0_i32_1 = arith.constant 0 : i32
    return %arg0, %c0_i32, %c0_i32_0 : i32, i32, i32
  }
  func.func @transform_7(%arg0: i32, %arg1: i32) -> (i32, i32, i32) {
    %c0_i32 = arith.constant 0 : i32
    %c0_i32_0 = arith.constant 0 : i32
    %c0_i32_1 = arith.constant 0 : i32
    return %arg0, %c0_i32, %c0_i32_0 : i32, i32, i32
  }
  func.func @transform_8(%arg0: i32, %arg1: i32) -> (i32, i32, i32) {
    %c0_i32 = arith.constant 0 : i32
    %c0_i32_0 = arith.constant 0 : i32
    %c0_i32_1 = arith.constant 0 : i32
    return %arg0, %c0_i32, %c0_i32_0 : i32, i32, i32
  }
  func.func @transform_9(%arg0: i32, %arg1: i32) -> (i32, i32) {
    %c0_i32 = arith.constant 0 : i32
    %c0_i32_0 = arith.constant 0 : i32
    return %c0_i32, %arg1 : i32, i32
  }
  func.func @transform_10(%arg0: i32, %arg1: i32) -> (i32, i32, i32) {
    %c0_i32 = arith.constant 0 : i32
    %c0_i32_0 = arith.constant 0 : i32
    return %arg0, %c0_i32, %arg1 : i32, i32, i32
  }
  func.func @transform_11(%arg0: i32, %arg1: i32) -> (i32, i32, i32) {
    %c0_i32 = arith.constant 0 : i32
    %c0_i32_0 = arith.constant 0 : i32
    return %arg0, %c0_i32, %arg1 : i32, i32, i32
  }
}

</mosaic_0001>

<bundles_post_ra>
// kernel: tpu_custom_call.1
= control target key start
LH: loop header
LB: loop body
LE: loop exit
PB: predicated region body
PF: predicated region fallthrough
CT: control target
= control target key end

     0   :  { %s1847_s0 = inlined_call_operand.vmem [shape: f32[2,4,256], index: 0, kind: input, shape index: {}]   ;;  %s1848_s1 = inlined_call_operand.vmem [shape: f32[2,4,256], index: 1, kind: input, shape index: {}]   ;;  %s1849_s2 = inlined_call_operand.hbm [shape: f32[2,4,256], index: 2, kind: input, shape index: {}]   ;;  %s1850_s3 = inlined_call_operand.hbm [shape: f32[2,4,256], index: 3, kind: input, shape index: {}]   ;;  %s1851_s4 = inlined_call_operand.vmem [shape: f32[2,4,4], index: 4, kind: input, shape index: {}]   ;;  %s1852_s5 = inlined_call_operand.vmem [shape: f32[2,4,4], index: 5, kind: input, shape index: {}]   ;;  %s1853_s6 = inlined_call_operand.vmem [shape: f32[2,4,1], index: 6, kind: input, shape index: {}]   ;;  %s1854_s7 = inlined_call_operand.vmem [shape: f32[2,4,1], index: 7, kind: input, shape index: {}]   ;;  %s1855_s8 = inlined_call_operand.vmem [shape: s32[2,4,1], index: 8, kind: input, shape index: {}]   ;;  %s1856_s9 = inlined_call_operand.vmem [shape: s32[1,256], index: 9, kind: input, shape index: {}]   ;;  %s1857_s10 = inlined_call_operand.hbm [shape: f32[2,4,256], index: 10, kind: output, shape index: {0}]   ;;  %s1858_s11 = inlined_call_operand.hbm [shape: f32[2,4,256], index: 11, kind: output, shape index: {1}]  }
   0x1   :  { %1872 = sst [smem:[#allocation22_spill]] %s1849_s2 }
   0x2   :  { %1873 = sst [smem:[#allocation23_spill]] %s1850_s3 }
   0x3   :  { %1874 = sst [smem:[#allocation24_spill]] %s1857_s10 }
   0x4   :  { %17 = vsyncpa [#allocation3], 0 }
   0x5   :  { %19 = vsyncpa [#allocation3 + $0x1], 0 }
   0x6   :  { %20 = vsyncpa [#allocation6], 0 }
   0x7   :  { %22 = vsyncpa [#allocation6 + $0x1], 0 }
   0x8   :  { %23 = vsyncpa [#allocation4], 0 }
   0x9   :  { %25 = vsyncpa [#allocation4 + $0x1], 0 }
   0xa   :  { %26 = vsyncpa [#allocation9], 0 }
   0xb   :  { %28 = vsyncpa [#allocation9 + $0x1], 0  ;;  %s1548_s17 = smov 0   ;;  %s1550_s18 = smov 0  }
   0xc   :  { %s1552_s19 = smov 0   ;;  %s1554_s20 = smov 0  }
   0xd   :  { %s1556_s21 = smov 0   ;;  %s1558_s22 = smov 0  }
   0xe LB: > { %1875 = sst [smem:[#allocation14_spill]] %s1460_s17  ;;  %s1175_s23 = sadd.s32 4294967295, %s1480_s22   ;;  %s1480_s22 = sphi %s1558_s22, %s34_s22   ;;  %s1476_s21 = sphi %s1556_s21, %s1909_s21   ;;  %s1472_s20 = sphi %s1554_s20, %s1908_s20   ;;  %s1468_s19 = sphi %s1552_s19, %s1907_s19   ;;  %s1464_s18 = sphi %s1550_s18, %s1906_s18   ;;  %s1460_s17 = sphi %s1548_s17, %s1905_s17  }
   0xf   : > { %1876 = sst [smem:[#allocation15_spill]] %s1464_s18  ;;  %s1176_s24 = sadd.s32 4294967294, %s1480_s22  }
  0x10   : > { %1877 = sst [smem:[#allocation16_spill]] %s1468_s19  ;;  %s46_s25 = sadd.s32 1, %s1476_s21 }
  0x11   : > { %1878 = sst [smem:[#allocation17_spill]] %s1476_s21  ;;  %s111_s26 = sadd.s32 1, %s1468_s19 }
  0x12   : > { %1879 = sst [smem:[#allocation18_spill]] %s1480_s22  ;;  %p48_p0 = scmp.ge.s32.totalorder %s46_s25, 2 }
  0x13   : > { %p118_p1 = scmp.ne.s32.totalorder %s1468_s19, %s1464_s18  ;;  %p119_p2 = scmp.eq.s32.totalorder %s1480_s22, 0 }
  0x14   : > { %p124_p3 = scmp.ne.s32.totalorder %s1464_s18, %s1460_s17  ;;  %s1911_s25 = smov (%p48_p0, %s46_s25), 0 }
  0x15   : > { %1880 = sst [smem:[#allocation19_spill]] %s1911_s25  ;;  %p1589_p4 = por %p119_p2, %p118_p1 }
  0x16   : > { %p125_p5 = scmp.eq.s32.totalorder %s1175_s23, 0  ;;  %s106_s28 = ssub.s32 %s1476_s21, %s1911_s25 }
  0x17   : > { %p334_p6 = scmp.eq.s32.totalorder %s1175_s23, 1  ;;  %p109_p7 = scmp.eq.s32.totalorder %s106_s28, 0 }
  0x18   : > { %p1595_p8 = por %p125_p5, %p124_p3  ;;  %p340_p10 = scmp.eq.s32.totalorder %s1176_s24, 1 }
  0x19   : > { %p1599_p9 = por %p334_p6, %p118_p1  ;;  %p1246_p13 = scmp.lt.s32.totalorder %s1480_s22, 2 }
  0x1a   : > { %s1882_s29 = scalar_select %p1595_p8, 1, 0 }
  0x1b   : > { %s1883_s30 = scalar_select %p1599_p9, 1, 0 }
  0x1c   : > { %s1604_s12 = scalar_select %p109_p7, %s1468_s19, %s111_s26  }
  0x1d   : > { %p1606_p11 = por %p340_p10, %p124_p3  ;;  %s1613_s14 = sand.u32 1, %s1468_s19  }
  0x1e   : > { %1884 = sst [smem:[#allocation20_spill]] %s1604_s12  ;;  %s1860_s15 = sshll.u32 %s1613_s14, 3 }
  0x1f   : > { %s1885_s13 = scalar_select %p1606_p11, 1, 0 }
  0x20   : > { %s1861_s16 = sshll.u32 %s1476_s21, 7  ;;  %s1887_s2 = sld [smem:[#allocation22_spill]] }
  0x21   : > { %1886 = sst [smem:[#allocation21_spill]] %s1885_s13  ;;  %s426_s26 = scalar_lea.vmem [#allocation2], %s1860_s15 }
  0x22   : > { %s436_s25 = sshll.u32 %s426_s26, 4  ;;  %p1630_p0 = pnand %p1246_p13, %p1589_p4  ;;  %s1626_s25 = int_to_ptr.vmem [resolvable:$true] %s436_s25 }
  0x23   : > { %s423_s23 = scalar_lea.sflag [#allocation3], %s1613_s14 }
  0x24   : > { %p1304_p5 = pneg %p1630_p0 }
  0x26   : > { %s1622_s24 = scalar_lea.hbm %s1887_s2, %s1861_s16  ;;  %s1307_s27 = scalar_lea.hbm %s1887_s2, 256 }
  0x27   : > { %s1302_s28 = scalar_lea.hbm %s1622_s24, 128  ;;  %p1308_p4 = scmp.lt.u32.totalorder %s1622_s24, %s1887_s2 }
  0x28   : > { %p1303_p3 = scmp.ne.s32.totalorder %s1622_s24, %s1302_s28  ;;  %p1309_p10 = scmp.lt.u32.totalorder %s1307_s27, %s1302_s28 }
  0x29   : > { %p1311_p12 = scmp.lt.u32.totalorder %s1302_s28, %s1622_s24 }
  0x2a   : > { %p1305_p6 = pnand %p1304_p5, %p1303_p3  ;;  %p1310_p13 = por %p1309_p10, %p1308_p4 }
  0x2c   : > { %p1306_p7 = pneg %p1305_p6  ;;  %p1312_p1 = por %p1311_p12, %p1310_p13 }
  0x2e   : > { %p1313_p2 = pnand %p1312_p1, %p1306_p7 }
  0x30   : > { %1316 = shalt.err (!%p1313_p2)
}
  0x31   : > { %s1317_s13 = scalar_lea.vmem %s1626_s25, 128  ;;  %s1482_s15 = smov [#allocation2]  }
  0x32   : > { %p1318_p3 = scmp.ne.s32.totalorder %s1626_s25, %s1317_s13  ;;  %s1322_s26 = sshll.u32 %s1482_s15, 4  ;;  %s1323_s26 = int_to_ptr.vmem [resolvable:$false] %s1322_s26 }
  0x33   : > { %s1324_s19 = scalar_lea.vmem %s1323_s26, 256  ;;  %p1325_p9 = scmp.lt.s32.totalorder %s1626_s25, %s1323_s26 }
  0x34   : > { %p1320_p6 = pnand %p1318_p3, %p1304_p5  ;;  %p1326_p4 = scmp.lt.s32.totalorder %s1324_s19, %s1317_s13 }
  0x36   : > { %p1321_p11 = pneg %p1320_p6  ;;  %p1327_p10 = por %p1326_p4, %p1325_p9 }
  0x38   : > { %p1328_p12 = pnand %p1327_p10, %p1321_p11 }
  0x3a   : > { %1331 = shalt.err (!%p1328_p12)
}
  0x3b   : > { %1235 = dma.hbm_to_vmem [thread:$0]  (!%p1630_p0), %s1622_s24, 128, %s1626_s25, %s423_s23  }
  0x3c   : > { %p1889_p1 = scmp.lt.s32.totalorder %s1480_s22, 3  ;;  %p1890_p2 = scmp.ge.s32.totalorder %s1480_s22, 1 }
  0x3d   : > { %s1892_s13 = sshll.u32 %s1476_s21, 7  ;;  %s1893_s3 = sld [smem:[#allocation23_spill]] }
  0x3e   : > { %p1666_p7 = pnand %p1890_p2, %p1889_p1  ;;  %s1894_s26 = sshll.u32 %s1613_s14, 3 }
  0x3f   : > { %s447_s19 = scalar_lea.vmem [#allocation5], %s1894_s26  ;;  %s444_s25 = scalar_lea.sflag [#allocation6], %s1613_s14 }
  0x40   : > { %s1891_s16 = scalar_select %p1666_p7, 1, 0 }
  0x41   : > { %s457_s2 = sshll.u32 %s447_s19, 4  ;;  %s458_s2 = int_to_ptr.vmem [resolvable:$true] %s457_s2 }
  0x43   : > { %s1675_s15 = scalar_lea.hbm %s1893_s3, %s1892_s13  ;;  %s1337_s13 = scalar_lea.hbm %s1893_s3, 256 }
  0x44   : > { %s1332_s24 = scalar_lea.hbm %s1675_s15, 128  ;;  %p1338_p3 = scmp.lt.u32.totalorder %s1675_s15, %s1893_s3 }
  0x45   : > { %p1333_p9 = scmp.ne.s32.totalorder %s1675_s15, %s1332_s24  ;;  %p1339_p6 = scmp.lt.u32.totalorder %s1337_s13, %s1332_s24 }
  0x46   : > { %p1341_p10 = scmp.lt.u32.totalorder %s1332_s24, %s1675_s15 }
  0x47   : > { %p1335_p11 = pnand %p1333_p9, %p1304_p5  ;;  %p1340_p4 = por %p1339_p6, %p1338_p3 }
  0x49   : > { %p1336_p13 = pneg %p1335_p11  ;;  %p1342_p12 = por %p1341_p10, %p1340_p4 }
  0x4b   : > { %p1343_p1 = pnand %p1342_p12, %p1336_p13 }
  0x4d   : > { %1346 = shalt.err (!%p1343_p1)
}
  0x4e   : > { %s1347_s14 = scalar_lea.vmem %s458_s2, 128  ;;  %s1483_s26 = smov [#allocation5]  }
  0x4f   : > { %p1348_p2 = scmp.ne.s32.totalorder %s458_s2, %s1347_s14  ;;  %s1352_s21 = sshll.u32 %s1483_s26, 4  ;;  %s1353_s21 = int_to_ptr.vmem [resolvable:$false] %s1352_s21 }
  0x50   : > { %s1354_s19 = scalar_lea.vmem %s1353_s21, 256  ;;  %p1355_p8 = scmp.lt.s32.totalorder %s458_s2, %s1353_s21 }
  0x51   : > { %p1350_p9 = pnand %p1348_p2, %p1304_p5  ;;  %p1356_p7 = scmp.lt.s32.totalorder %s1354_s19, %s1347_s14 }
  0x53   : > { %p1351_p11 = pneg %p1350_p9  ;;  %p1357_p3 = por %p1356_p7, %p1355_p8 }
  0x55   : > { %p1358_p6 = pnand %p1357_p3, %p1351_p11 }
  0x57   : > { %1361 = shalt.err (!%p1358_p6)
}
  0x58   : > { %1238 = dma.hbm_to_vmem [thread:$0]  (!%p1630_p0), %s1675_s15, 128, %s458_s2, %s444_s25  }
  0x59   : > { %p1895_p13 = scmp.ne.s32.totalorder %s1891_s16, 0 }
  0x5a   : > { %s1702_s24 = sand.u32 (!%p1895_p13), 1, %s1464_s18   ;;  %p1896_p8 = scmp.ne.s32.totalorder (!%p1895_p13), %s1882_s29, 0 }
  0x5b   : > { %501 = sbr.rel (%p1895_p13) target bundleno = 374 (0x176), region = 60  ;;  %s1705_s23 = sshll.u32 (!%p1895_p13), %s1702_s24, 3 }
  0x5c   : > { %s504_s13 = scalar_lea.sflag (!%p1895_p13), [#allocation3], %s1702_s24  ;;  %s507_s28 = scalar_lea.vmem (!%p1895_p13), [#allocation2], %s1705_s23 }
  0x62   : > { %1443 = dma.done.wait (%p1896_p8), %s504_s13, 128  }
  0x63   : > { %1445 = vsyncadd (%p1896_p8), %s504_s13, 4294967168  ;;  %s513_s2 = scalar_lea.sflag [#allocation6], %s1702_s24 }
  0x64   : > { %1447 = dma.done.wait (%p1896_p8), %s513_s2, 128  }
  0x65   : > { %1449 = vsyncadd (%p1896_p8), %s513_s2, 4294967168  ;;  %p608_p0 = scmp.lt.s32.totalorder %s1472_s20, 1  ;;  %v1484_v0 = vmov 0.0   ;;  %v1485_v1 = vmov 0   ;;  %v659_v2 = vld [vmem:[%s507_s28] sm:$0xff]  ;;  %vm666_vm0 = vcmask 1043456   ;;  %v841_v11 = vlaneseq }
  0x66   : > { %735 = vmatprep.mubr.f32.mxu1 %v1484_v0  ;;  %815 = vmatprep.mubr.f32.mxu0 %v1484_v0  ;;  %v661_v4 = vcombine.high %v659_v2, %v659_v2  ;;  %vm662_vm1 = vcmask 31744   ;;  %v839_v15 = vld [vmem:[%s1856_s9] sm:$0x3]  ;;  %s1897_s28 = scalar_lea.vmem [#allocation5], %s1705_s23  ;;  %s1898_s29 = sld [smem:[#allocation24_spill]] }
  0x67   : > { %s1721_s16 = scalar_select %p608_p0, %s1472_s20, 1  ;;  %1298 = vset.pattern.permute.xlu0 %v1485_v1  ;;  %1299 = vset.pattern.permute.xlu1 %v1485_v1  ;;  %v842_v12 = vshrl.u32 %v841_v11, 7  ;;  %v838_v23 = vld [vmem:[%s1897_s28] sm:$0xff] }
  0x68   : > { %1200 = vmatprep.subr.msk.mxu1 %vm666_vm0, %v661_v4  ;;  %p1899_p7 = scmp.ne.s32.totalorder %s1883_s30, 0  ;;  %s1486_s10 = smov [#allocation8]  }
  0x69   : > { %s1218_s15 = sshll.u32 %s1721_s16, 3  ;;  %s1195_s25 = sshll.u32 %s1721_s16, 2  ;;  %1201 = vmatpush1.msk.msra.mxu1 %vm666_vm0, %v659_v2  ;;  %v843_v13 = vsub.s32 0, %v842_v12  ;;  %v847_v14 = vsub.s32 1, %v842_v12 }
  0x6a   : > { %s615_s14 = scalar_lea.vmem %s1847_s0, %s1218_s15  ;;  %s636_s19 = scalar_lea.vmem %s1852_s5, %s1195_s25 }
  0x6b   : > { %s632_s12 = scalar_lea.vmem %s1851_s4, %s1195_s25  ;;  %v656_v3 = vld [vmem:[%s615_s14] sm:$0xff]  ;;  %s648_s22 = scalar_lea.vmem %s1855_s8, %s1195_s25  ;;  %v844_v16 = vrot.slane %v839_v15, %v843_v13  ;;  %v848_v17 = vrot.slane %v839_v15, %v847_v14 }
  0x6c   : > { %s640_s27 = scalar_lea.vmem %s1853_s6, %s1195_s25  ;;  %v743_v5 = vcombine.high %v656_v3, %v656_v3  ;;  %v840_v6 = vld [vmem:[%s648_s22] sm:$0xf]  ;;  %s644_s21 = scalar_lea.vmem %s1854_s7, %s1195_s25 }
  0x6d   : > { %v658_v7 = vld [vmem:[%s636_s19] sm:$0xf]  ;;  %850 = vperm.xlu0 %1298, %v840_v6   ;;  %s625_s22 = scalar_lea.vmem %s1848_s1, %s1218_s15  ;;  %s606_s16 = scalar_lea.vmem [#allocation8], %s1705_s23 }
  0x6e   : > { %v657_v8 = vld [vmem:[%s632_s12] sm:$0xf]  ;;  %1203 = vmatprep.subr.msk.mxu0 %vm666_vm0, %v743_v5  ;;  %1202 = vmatmul.mubr.msk.f32.vlgmr.msra.gmra.mrb[0].mxu1 %vm662_vm1, %v658_v7  ;;  %s1220_s12 = sshll.u32 %s1472_s20, 7  ;;  %s922_s15 = sshll.u32 %s606_s16, 4  ;;  %s1769_s15 = int_to_ptr.vmem [resolvable:$true] %s922_s15 }
  0x6f   : > { %v822_v9 = vld [vmem:[%s640_s27] sm:$0xf]  ;;  %1204 = vmatpush1.msk.msra.mxu0 %vm666_vm0, %v656_v3  ;;  %s599_s25 = scalar_lea.vmem [#allocation7], %s1705_s23  ;;  %s1767_s2 = scalar_lea.hbm %s1858_s11, %s1220_s12 }
  0x70   : > { %v866_v10 = vld [vmem:[%s644_s21] sm:$0xf]  ;;  %1205 = vmatmul.mubr.msk.f32.vlgmr.msra.gmra.mrb[0].mxu0 %vm662_vm1, %v657_v8  ;;  %s906_s14 = sshll.u32 %s599_s25, 4  ;;  %s1774_s26 = scalar_lea.hbm %s1898_s29, %s1220_s12  ;;  %s1776_s14 = int_to_ptr.vmem [resolvable:$true] %s906_s14 }
  0x71   : > { %825 = vperm.xlu0 %1298, %v822_v9   ;;  %869 = vperm.xlu1 %1299, %v866_v10   ;;  %v830_v22 = vld [vmem:[%s625_s22] sm:$0xff]  ;;  %s890_s21 = scalar_lea.sflag [#allocation9], %s1702_s24  ;;  %s1362_s3 = scalar_lea.vmem %s1769_s15, 128 }
  0x72   : > { %v831_v26 = vsub.f32 %v830_v22, %v656_v3  ;;  %p1363_p5 = scmp.ne.s32.totalorder %s1769_s15, %s1362_s3  ;;  %s1366_s17 = sshll.u32 %s1486_s10, 4  ;;  %s1367_s17 = int_to_ptr.vmem [resolvable:$false] %s1366_s17 }
  0x73   : > { %s1368_s18 = scalar_lea.vmem %s1367_s17, 256  ;;  %p1369_p12 = scmp.lt.s32.totalorder %s1769_s15, %s1367_s17 }
  0x74   : > { %v832_v35 = vmul.f32 0.0015, %v831_v26  ;;  %p1364_p4 = pnand %p1363_p5, %p1899_p7  ;;  %p1370_p1 = scmp.lt.s32.totalorder %s1368_s18, %s1362_s3 }
  0x76   : > { %p1365_p10 = pneg %p1364_p4  ;;  %p1371_p2 = por %p1370_p1, %p1369_p12 }
  0x78   : > { %p1372_p9 = pnand %p1371_p2, %p1365_p10 }
  0xec   : > { %v851_v18 = vpop.permute.xlu0 %850 }
  0xed   : > { %vm852_vm2 = vcmp.lt.s32.totalorder %v844_v16, %v851_v18  ;;  %vm853_vm3 = vcmp.lt.s32.totalorder %v848_v17, %v851_v18 }
  0xee   : > { %v1206_v19 = vsel %vm852_vm2, 1.0, %v1484_v0  ;;  %v1207_v20 = vsel %vm853_vm3, 1.0, %v1484_v0 }
  0xef   : > { %v860_v21 = vcombine.low %v1206_v19, %v1207_v20 }
  0xf0   : > { %v826_v31 = vpop.permute.xlu0 %825  ;;  %v870_v37 = vpop.permute.xlu1 %869 }
  0xf1   : > { %v864_v27 = vmul.f32 %v860_v21, %v838_v23  ;;  %v862_v42 = vmul.f32 %v860_v21, %v656_v3 }
  0xf3   : > { %v873_v36 = vcombine.high %v864_v27, %v864_v27  ;;  %v875_v40 = vmul.f32 %v870_v37, %v864_v27 }
  0xf5   : > { %v876_v41 = vmul.f32 %v873_v36, %v870_v37 }
  0xf7   : > { %v879_v45 = vcombine.low %v875_v40, %v876_v41 }
 0x141   : > { %v737_v24 = vpop.f32.mrb[0].mxu1 }
 0x142   : > { %v739_v29 = vpop.f32.mrb[1].mxu1 }
 0x143   : > { %v817_v25 = vpop.f32.mrb[0].mxu0 }
 0x144   : > { %v818_v28 = vadd.f32 %v817_v25, %v737_v24  ;;  %v819_v30 = vpop.f32.mrb[1].mxu0 }
 0x145   : > { %v820_v32 = vadd.f32 %v819_v30, %v739_v29 }
 0x146   : > { %v828_v33 = vadd.f32 %v826_v31, %v818_v28 }
 0x147   : > { %v829_v34 = vadd.f32 %v826_v31, %v820_v32 }
 0x149   : > { %v835_v38 = vcombine.low %v828_v33, %v829_v34 }
 0x14b   : > { %v837_v39 = vsub.f32 %v832_v35, %v835_v38 }
 0x14d   : > { %v863_v43 = vmul.f32 %v860_v21, %v837_v39 }
 0x14f   : > { %v865_v44 = vsub.f32 %v862_v42, %v863_v43 }
 0x151   : > { %v881_v46 = vadd.f32 %v879_v45, %v865_v44  ;;  %883 = vst [vmem:[%s606_s16] sm:$0xff] %v865_v44 }
 0x152   : > { %1375 = shalt.err (!%p1372_p9)
}
 0x153   : > { %s1376_s22 = scalar_lea.hbm %s1767_s2, 128  ;;  %s1380_s16 = scalar_lea.hbm %s1858_s11, 256 }
 0x154   : > { %p1377_p11 = scmp.ne.s32.totalorder %s1767_s2, %s1376_s22  ;;  %p1381_p13 = scmp.lt.u32.totalorder %s1767_s2, %s1858_s11 }
 0x155   : > { %p1382_p8 = scmp.lt.u32.totalorder %s1380_s16, %s1376_s22  ;;  %p1384_p5 = scmp.lt.u32.totalorder %s1376_s22, %s1767_s2 }
 0x156   : > { %p1378_p3 = pnand %p1377_p11, %p1899_p7 }
 0x157   : > { %p1383_p0 = por %p1382_p8, %p1381_p13 }
 0x158   : > { %p1379_p6 = pneg %p1378_p3 }
 0x159   : > { %p1385_p4 = por %p1384_p5, %p1383_p0 }
 0x15b   : > { %p1386_p10 = pnand %p1385_p4, %p1379_p6 }
 0x15d   : > { %1389 = shalt.err (!%p1386_p10)
}
 0x15e   : > { %1229 = dma.vmem_to_hbm [thread:$0]  (%p1899_p7), %s1769_s15, 128, %s1767_s2, %s890_s21   ;;  %882 = vst [vmem:[%s599_s25] sm:$0xff] %v881_v46 }
 0x15f   : > { %s885_s20 = scalar_lea.sflag [#allocation4], %s1702_s24  ;;  %s1390_s27 = scalar_lea.vmem %s1776_s14, 128 }
 0x160   : > { %p1391_p12 = scmp.ne.s32.totalorder %s1776_s14, %s1390_s27  ;;  %s1487_s3 = smov [#allocation7]  }
 0x161   : > { %s1394_s10 = sshll.u32 %s1487_s3, 4  ;;  %s1395_s10 = int_to_ptr.vmem [resolvable:$false] %s1394_s10 }
 0x162   : > { %p1392_p1 = pnand %p1391_p12, %p1899_p7  ;;  %s1396_s17 = scalar_lea.vmem %s1395_s10, 256 }
 0x163   : > { %p1397_p9 = scmp.lt.s32.totalorder %s1776_s14, %s1395_s10  ;;  %p1398_p11 = scmp.lt.s32.totalorder %s1396_s17, %s1390_s27 }
 0x164   : > { %p1393_p2 = pneg %p1392_p1 }
 0x165   : > { %p1399_p3 = por %p1398_p11, %p1397_p9 }
 0x167   : > { %p1400_p6 = pnand %p1399_p3, %p1393_p2 }
 0x169   : > { %1403 = shalt.err (!%p1400_p6)
}
 0x16a   : > { %s1404_s24 = scalar_lea.hbm %s1774_s26, 128  ;;  %s1408_s25 = scalar_lea.hbm %s1898_s29, 256 }
 0x16b   : > { %p1405_p13 = scmp.ne.s32.totalorder %s1774_s26, %s1404_s24  ;;  %p1409_p5 = scmp.lt.u32.totalorder %s1774_s26, %s1898_s29 }
 0x16c   : > { %p1410_p4 = scmp.lt.u32.totalorder %s1408_s25, %s1404_s24  ;;  %p1412_p12 = scmp.lt.u32.totalorder %s1404_s24, %s1774_s26 }
 0x16d   : > { %p1406_p8 = pnand %p1405_p13, %p1899_p7 }
 0x16e   : > { %p1411_p10 = por %p1410_p4, %p1409_p5 }
 0x16f   : > { %p1407_p0 = pneg %p1406_p8 }
 0x170   : > { %p1413_p1 = por %p1412_p12, %p1411_p10 }
 0x172   : > { %p1414_p2 = pnand %p1413_p1, %p1407_p0 }
 0x174   : > { %1417 = shalt.err (!%p1414_p2)
}
 0x175   : > { %1228 = dma.vmem_to_hbm [thread:$0]  (%p1899_p7), %s1776_s14, 128, %s1774_s26, %s885_s20  }
 0x176 PF: > { %s1900_s18 = sld [smem:[#allocation14_spill]]  ;;  %s1901_s22 = sld [smem:[#allocation21_spill]] }
 0x177   : > { %s1902_s28 = sld [smem:[#allocation18_spill]] }
 0x17c   : > { %s934_s12 = sand.u32 1, %s1900_s18   ;;  %p1903_p9 = scmp.ne.s32.totalorder %s1901_s22, 0 }
 0x17d   : > { %p1904_p11 = scmp.ge.s32.totalorder %s1902_s28, 2  ;;  %s935_s16 = scalar_lea.sflag [#allocation4], %s934_s12 }
 0x17f   : > { %p1240_p3 = pnand %p1904_p11, %p1903_p9 }
 0x181   : > { %1451 = dma.done.wait (!%p1240_p3), %s935_s16, 128  }
 0x182   : > { %1453 = vsyncadd (!%p1240_p3), %s935_s16, 4294967168  ;;  %s944_s19 = scalar_lea.sflag [#allocation9], %s934_s12 }
 0x183   : > { %1455 = dma.done.wait (!%p1240_p3), %s944_s19, 128  }
 0x184   : > { %1457 = vsyncadd (!%p1240_p3), %s944_s19, 4294967168  ;;  %s34_s22 = sadd.s32 1, %s1902_s28   ;;  %s1905_s17 = sld [smem:[#allocation15_spill]] }
 0x185   : > { %p31_p6 = scmp.ge.s32.totalorder %s34_s22, 4   ;;  %s1906_s18 = sld [smem:[#allocation16_spill]] }
 0x186   : > { %s1907_s19 = sld [smem:[#allocation20_spill]]  ;;  %s1908_s20 = sld [smem:[#allocation17_spill]] }
 0x187   : > { %s1909_s21 = sld [smem:[#allocation19_spill]]  ;;  %33 = sbr.rel (!%p31_p6) target bundleno = 14 (0xe), region = 159 }
 0x18e   :  { %949 = vsyncpa [#allocation3], 1 }
 0x18f   :  { %951 = vsyncpa [#allocation3 + $0x1], 1 }
 0x190   :  { %952 = vsyncpa [#allocation6], 1 }
 0x191   :  { %954 = vsyncpa [#allocation6 + $0x1], 1 }
 0x192   :  { %955 = vsyncpa [#allocation4], 1 }
 0x193   :  { %957 = vsyncpa [#allocation4 + $0x1], 1 }
 0x194   :  { %958 = vsyncpa [#allocation9], 1 }
 0x195   :  { %960 = vsyncpa [#allocation9 + $0x1], 1 }

</bundles_post_ra>
